<compile_context>
chip_gen: v6e
topology: v6e:2x2x1
jax: 0.10.0
libtpu: 0.0.40
codegen_flags: <defaults>
</compile_context>

<pallas_src>
import jax
import jax.numpy as jnp
from jax import lax
from jax.experimental import pallas as pl
from jax.experimental.pallas import tpu as pltpu


def _round_up(x, m):
    return ((x + m - 1) // m) * m


def _bayesian_linear_kernel(x_ref, wmu_ref, wls_ref, epsw_ref,
                            bmu_ref, bls_ref, epsb_ref, o_ref, acc_ref):
    k = pl.program_id(2)

    @pl.when(k == 0)
    def _init():
        acc_ref[...] = jnp.zeros_like(acc_ref)

    # Sample weight tile:  W = mu + exp(log_sigma) * eps      [tn, tk]
    w = wmu_ref[...] + jnp.exp(wls_ref[...]) * epsw_ref[...]

    # x tile [tm, tk] · W tile [tn, tk], contracted on the shared k axis.
    # (No transpose materialized; MXU matmul with f32 accumulation.)
    acc_ref[...] += lax.dot_general(
        x_ref[...], w,
        dimension_numbers=(((1,), (1,)), ((), ())),
        preferred_element_type=jnp.float32)

    @pl.when(k == pl.num_programs(2) - 1)
    def _finalize():
        # Sample the bias exactly once, in the epilogue of the K reduction.
        b = bmu_ref[...] + jnp.exp(bls_ref[...]) * epsb_ref[...]   # [1, tn]
        o_ref[...] = (acc_ref[...] + b).astype(o_ref.dtype)


def bayesian_linear_forward(x, weight_mu, weight_log_sigma,
                            bias_mu, bias_log_sigma, eps_w, eps_b,
                            *, tm=256, tn=256, tk=512):
    """x: [B, in], weight_*: [out, in], bias_*: [out], eps_w: [out, in], eps_b: [out]."""
    B, in_features = x.shape
    out_features = weight_mu.shape[0]

    # Tile sizes: sublane dim multiple of 8, lane dims multiple of 128;
    # never larger than the (aligned) problem dims.
    tm = min(tm, _round_up(B, 8))
    tn = min(tn, _round_up(out_features, 128))
    tk = min(tk, _round_up(in_features, 128))

    Bp = _round_up(B, tm)
    Np = _round_up(out_features, tn)
    Kp = _round_up(in_features, tk)

    # Zero padding is exact: padded x columns are 0 so padded-K contributions
    # vanish; padded output rows/cols are sliced off below.
    xp = jnp.pad(x, ((0, Bp - B), (0, Kp - in_features)))
    wmu = jnp.pad(weight_mu, ((0, Np - out_features), (0, Kp - in_features)))
    wls = jnp.pad(weight_log_sigma, ((0, Np - out_features), (0, Kp - in_features)))
    ew = jnp.pad(eps_w, ((0, Np - out_features), (0, Kp - in_features)))
    bmu = jnp.pad(bias_mu, (0, Np - out_features)).reshape(1, Np)
    bls = jnp.pad(bias_log_sigma, (0, Np - out_features)).reshape(1, Np)
    eb = jnp.pad(eps_b, (0, Np - out_features)).reshape(1, Np)

    grid = (Bp // tm, Np // tn, Kp // tk)

    # Rough VMEM budget: double-buffered inputs (x + 3 weight streams + 3 bias
    # rows) + accumulator + double-buffered output, all f32.
    est_bytes = 4 * (2 * (tm * tk + 3 * tn * tk + 3 * tn) + 3 * tm * tn)
    vmem_limit = int(min(100 * 2**20, max(32 * 2**20, 2 * est_bytes)))

    out = pl.pallas_call(
        _bayesian_linear_kernel,
        out_shape=jax.ShapeDtypeStruct((Bp, Np), x.dtype),
        grid_spec=pltpu.PrefetchScalarGridSpec(
            num_scalar_prefetch=0,
            grid=grid,
            in_specs=[
                pl.BlockSpec((tm, tk), lambda i, j, k: (i, k)),   # x
                pl.BlockSpec((tn, tk), lambda i, j, k: (j, k)),   # weight_mu
                pl.BlockSpec((tn, tk), lambda i, j, k: (j, k)),   # weight_log_sigma
                pl.BlockSpec((tn, tk), lambda i, j, k: (j, k)),   # eps_w
                pl.BlockSpec((1, tn), lambda i, j, k: (0, j)),    # bias_mu
                pl.BlockSpec((1, tn), lambda i, j, k: (0, j)),    # bias_log_sigma
                pl.BlockSpec((1, tn), lambda i, j, k: (0, j)),    # eps_b
            ],
            out_specs=pl.BlockSpec((tm, tn), lambda i, j, k: (i, j)),
            scratch_shapes=[pltpu.VMEM((tm, tn), jnp.float32)],
        ),
        compiler_params=pltpu.CompilerParams(
            dimension_semantics=("parallel", "parallel", "arbitrary"),
            vmem_limit_bytes=vmem_limit,
        ),
    )(xp, wmu, wls, ew, bmu, bls, eb)

    return out[:B, :out_features]


def reference_forward(x, weight_mu, weight_log_sigma,
                      bias_mu, bias_log_sigma, eps_w, eps_b):
    weight = weight_mu + jnp.exp(weight_log_sigma) * eps_w
    bias = bias_mu + jnp.exp(bias_log_sigma) * eps_b
    return x @ weight.T + bias


def _run_case(key, batch, in_features, out_features):
    k_x, k_wm, k_ws, k_bm, k_bs, k_ew, k_eb = jax.random.split(key, 7)
    x = jax.random.normal(k_x, (batch, in_features), dtype=jnp.float32)
    # Non-trivial parameters (module initializes them to zero; use random values
    # here so the test actually exercises the sampling math).
    weight_mu = 0.1 * jax.random.normal(k_wm, (out_features, in_features), dtype=jnp.float32)
    weight_log_sigma = -1.0 + 0.1 * jax.random.normal(k_ws, (out_features, in_features), dtype=jnp.float32)
    bias_mu = 0.1 * jax.random.normal(k_bm, (out_features,), dtype=jnp.float32)
    bias_log_sigma = -1.0 + 0.1 * jax.random.normal(k_bs, (out_features,), dtype=jnp.float32)
    # Deterministic Gaussian noise (torch.randn_like equivalent).
    eps_w = jax.random.normal(k_ew, (out_features, in_features), dtype=jnp.float32)
    eps_b = jax.random.normal(k_eb, (out_features,), dtype=jnp.float32)

    y = bayesian_linear_forward(x, weight_mu, weight_log_sigma,
                                bias_mu, bias_log_sigma, eps_w, eps_b)
    y = jax.block_until_ready(y)

    y_ref = reference_forward(x, weight_mu, weight_log_sigma,
                              bias_mu, bias_log_sigma, eps_w, eps_b)
    assert y.shape == (batch, out_features)
    assert jnp.allclose(y, y_ref, atol=1e-4, rtol=1e-4), \
        f"mismatch vs. reference for shape ({batch},{in_features})->({out_features})"


if __name__ == "__main__":
    key = jax.random.PRNGKey(0)
    k1, k2 = jax.random.split(key)

    # Small demo shapes consistent with a Linear layer (padded internally).
    _run_case(k1, batch=8, in_features=32, out_features=16)
    # Non-aligned shapes exercising the padding + multi-tile K reduction path.
    _run_case(k2, batch=24, in_features=200, out_features=80)

    print("KERNEL_OK")
</pallas_src>

<mosaic_0001>
module attributes {stable_mosaic.version = 11 : i64} {
  func.func @_bayesian_linear_kernel(%arg0: i32, %arg1: i32, %arg2: i32, %arg3: memref<8x128xf32, #tpu.memory_space<vmem>>, %arg4: memref<128x128xf32, #tpu.memory_space<vmem>>, %arg5: memref<128x128xf32, #tpu.memory_space<vmem>>, %arg6: memref<128x128xf32, #tpu.memory_space<vmem>>, %arg7: memref<1x128xf32, #tpu.memory_space<vmem>>, %arg8: memref<1x128xf32, #tpu.memory_space<vmem>>, %arg9: memref<1x128xf32, #tpu.memory_space<vmem>>, %arg10: memref<8x128xf32, #tpu.memory_space<vmem>>, %arg11: memref<8x128xf32, #tpu.memory_space<vmem>>) attributes {dimension_semantics = [#tpu.dimension_semantics<parallel>, #tpu.dimension_semantics<parallel>, #tpu.dimension_semantics<arbitrary>], iteration_bounds = array<i64: 1, 1, 1>, scalar_prefetch = 0 : i64, scratch_operands = 1 : i64, tpu.core_type = #tpu.core_type<tc>, window_params = [{transform_indices = @transform_0, window_bounds = array<i64: 8, 128>}, {transform_indices = @transform_1, window_bounds = array<i64: 128, 128>}, {transform_indices = @transform_2, window_bounds = array<i64: 128, 128>}, {transform_indices = @transform_3, window_bounds = array<i64: 128, 128>}, {transform_indices = @transform_4, window_bounds = array<i64: 1, 128>}, {transform_indices = @transform_5, window_bounds = array<i64: 1, 128>}, {transform_indices = @transform_6, window_bounds = array<i64: 1, 128>}, {transform_indices = @transform_7, window_bounds = array<i64: 8, 128>}]} {
    %c0_i32 = arith.constant 0 : i32
    %0 = arith.cmpi eq, %arg2, %c0_i32 : i32
    %1 = arith.extui %0 : i1 to i32
    %c0_i32_0 = arith.constant 0 : i32
    %2 = arith.cmpi ne, %1, %c0_i32_0 : i32
    scf.if %2 {
      %cst_14 = arith.constant 0.000000e+00 : f32
      %17 = vector.broadcast %cst_14 : f32 to vector<8x128xf32>
      %c0_15 = arith.constant 0 : index
      %c0_16 = arith.constant 0 : index
      %18 = vector.load %arg11[%c0_15, %c0_16] : memref<8x128xf32, #tpu.memory_space<vmem>>, vector<8x128xf32>
      tpu.vector_store %arg11[%c0_15, %c0_16], %17 {strides = array<i32>} : memref<8x128xf32, #tpu.memory_space<vmem>>, vector<8x128xf32>,
    } else {
    }
    %c0 = arith.constant 0 : index
    %c0_1 = arith.constant 0 : index
    %3 = vector.load %arg4[%c0, %c0_1] : memref<128x128xf32, #tpu.memory_space<vmem>>, vector<128x128xf32>
    %c0_2 = arith.constant 0 : index
    %c0_3 = arith.constant 0 : index
    %4 = vector.load %arg5[%c0_2, %c0_3] : memref<128x128xf32, #tpu.memory_space<vmem>>, vector<128x128xf32>
    %5 = math.exp %4 : vector<128x128xf32>
    %c0_4 = arith.constant 0 : index
    %c0_5 = arith.constant 0 : index
    %6 = vector.load %arg6[%c0_4, %c0_5] : memref<128x128xf32, #tpu.memory_space<vmem>>, vector<128x128xf32>
    %7 = arith.mulf %5, %6 : vector<128x128xf32>
    %8 = arith.addf %3, %7 : vector<128x128xf32>
    %c0_6 = arith.constant 0 : index
    %c0_7 = arith.constant 0 : index
    %9 = vector.load %arg11[%c0_6, %c0_7] : memref<8x128xf32, #tpu.memory_space<vmem>>, vector<8x128xf32>
    %c0_8 = arith.constant 0 : index
    %c0_9 = arith.constant 0 : index
    %10 = vector.load %arg3[%c0_8, %c0_9] : memref<8x128xf32, #tpu.memory_space<vmem>>, vector<8x128xf32>
    %cst = arith.constant dense<0.000000e+00> : vector<8x128xf32>
    %11 = tpu.matmul %10, %8, %cst {dimension_numbers = #tpu.dot_dimension_numbers<[1], [1], [0], [0], [0, 0, 1, 0], [], []>} : vector<8x128xf32>, vector<128x128xf32>, vector<8x128xf32> -> vector<8x128xf32>
    %12 = arith.addf %9, %11 : vector<8x128xf32>
    %c0_10 = arith.constant 0 : index
    %c0_11 = arith.constant 0 : index
    %13 = vector.load %arg11[%c0_10, %c0_11] : memref<8x128xf32, #tpu.memory_space<vmem>>, vector<8x128xf32>
    tpu.vector_store %arg11[%c0_10, %c0_11], %12 {strides = array<i32>} : memref<8x128xf32, #tpu.memory_space<vmem>>, vector<8x128xf32>,
    %c0_i32_12 = arith.constant 0 : i32
    %14 = arith.cmpi eq, %arg2, %c0_i32_12 : i32
    %15 = arith.extui %14 : i1 to i32
    %c0_i32_13 = arith.constant 0 : i32
    %16 = arith.cmpi ne, %15, %c0_i32_13 : i32
    scf.if %16 {
      %c0_14 = arith.constant 0 : index
      %c0_15 = arith.constant 0 : index
      %17 = vector.load %arg7[%c0_14, %c0_15] : memref<1x128xf32, #tpu.memory_space<vmem>>, vector<1x128xf32>
      %c0_16 = arith.constant 0 : index
      %c0_17 = arith.constant 0 : index
      %18 = vector.load %arg8[%c0_16, %c0_17] : memref<1x128xf32, #tpu.memory_space<vmem>>, vector<1x128xf32>
      %19 = math.exp %18 : vector<1x128xf32>
      %c0_18 = arith.constant 0 : index
      %c0_19 = arith.constant 0 : index
      %20 = vector.load %arg9[%c0_18, %c0_19] : memref<1x128xf32, #tpu.memory_space<vmem>>, vector<1x128xf32>
      %21 = arith.mulf %19, %20 : vector<1x128xf32>
      %22 = arith.addf %17, %21 : vector<1x128xf32>
      %c0_20 = arith.constant 0 : index
      %c0_21 = arith.constant 0 : index
      %23 = vector.load %arg11[%c0_20, %c0_21] : memref<8x128xf32, #tpu.memory_space<vmem>>, vector<8x128xf32>
      %24 = vector.broadcast %22 : vector<1x128xf32> to vector<8x128xf32>
      %25 = arith.addf %23, %24 : vector<8x128xf32>
      %c0_22 = arith.constant 0 : index
      %c0_23 = arith.constant 0 : index
      %26 = vector.load %arg10[%c0_22, %c0_23] : memref<8x128xf32, #tpu.memory_space<vmem>>, vector<8x128xf32>
      tpu.vector_store %arg10[%c0_22, %c0_23], %25 {strides = array<i32>} : memref<8x128xf32, #tpu.memory_space<vmem>>, vector<8x128xf32>,
    } else {
    }
    return
  }
  func.func @transform_0(%arg0: i32, %arg1: i32, %arg2: i32) -> (i32, i32) {
    %c0_i32 = arith.constant 0 : i32
    return %arg0, %arg2 : i32, i32
  }
  func.func @transform_1(%arg0: i32, %arg1: i32, %arg2: i32) -> (i32, i32) {
    %c0_i32 = arith.constant 0 : i32
    return %arg1, %arg2 : i32, i32
  }
  func.func @transform_2(%arg0: i32, %arg1: i32, %arg2: i32) -> (i32, i32) {
    %c0_i32 = arith.constant 0 : i32
    return %arg1, %arg2 : i32, i32
  }
  func.func @transform_3(%arg0: i32, %arg1: i32, %arg2: i32) -> (i32, i32) {
    %c0_i32 = arith.constant 0 : i32
    return %arg1, %arg2 : i32, i32
  }
  func.func @transform_4(%arg0: i32, %arg1: i32, %arg2: i32) -> (i32, i32) {
    %c0_i32 = arith.constant 0 : i32
    %c0_i32_0 = arith.constant 0 : i32
    return %c0_i32, %arg1 : i32, i32
  }
  func.func @transform_5(%arg0: i32, %arg1: i32, %arg2: i32) -> (i32, i32) {
    %c0_i32 = arith.constant 0 : i32
    %c0_i32_0 = arith.constant 0 : i32
    return %c0_i32, %arg1 : i32, i32
  }
  func.func @transform_6(%arg0: i32, %arg1: i32, %arg2: i32) -> (i32, i32) {
    %c0_i32 = arith.constant 0 : i32
    %c0_i32_0 = arith.constant 0 : i32
    return %c0_i32, %arg1 : i32, i32
  }
  func.func @transform_7(%arg0: i32, %arg1: i32, %arg2: i32) -> (i32, i32) {
    %c0_i32 = arith.constant 0 : i32
    return %arg0, %arg1 : i32, i32
  }
}

</mosaic_0001>

<bundles_post_ra>
// kernel: tpu_custom_call.1
= control target key start
LH: loop header
LB: loop body
LE: loop exit
PB: predicated region body
PF: predicated region fallthrough
CT: control target
= control target key end

     0   :  { %12 = vsyncpa [#allocation4], 0  ;;  %s609_s0 = inlined_call_operand.hbm [shape: f32[8,128], index: 0, kind: input, shape index: {}]   ;;  %s610_s1 = inlined_call_operand.hbm [shape: f32[128,128], index: 1, kind: input, shape index: {}]   ;;  %s611_s2 = inlined_call_operand.hbm [shape: f32[128,128], index: 2, kind: input, shape index: {}]   ;;  %s612_s3 = inlined_call_operand.hbm [shape: f32[128,128], index: 3, kind: input, shape index: {}]   ;;  %s613_s4 = inlined_call_operand.vmem [shape: f32[1,128], index: 4, kind: input, shape index: {}]   ;;  %s614_s5 = inlined_call_operand.vmem [shape: f32[1,128], index: 5, kind: input, shape index: {}]   ;;  %s615_s6 = inlined_call_operand.vmem [shape: f32[1,128], index: 6, kind: input, shape index: {}]   ;;  %s616_s7 = inlined_call_operand.hbm [shape: f32[8,128], index: 7, kind: output, shape index: {}]  }
   0x1   :  { %13 = vsyncpa [#allocation7], 0 }
   0x2   :  { %14 = vsyncpa [#allocation10], 0 }
   0x3   :  { %15 = vsyncpa [#allocation5], 0  ;;  %s510_s24 = smov [#allocation6]  }
   0x4   :  { %s31_s25 = sshll.u32 %s510_s24, 4  ;;  %s32_s25 = int_to_ptr.vmem [resolvable:$true] %s31_s25 }
   0x5   :  { %s410_s26 = scalar_lea.vmem %s32_s25, 2048  ;;  %p415_p1 = scmp.lt.s32.totalorder %s32_s25, %s32_s25 }
   0x6   :  { %p411_p0 = scmp.ne.s32.totalorder %s32_s25, %s410_s26  ;;  %p416_p2 = scmp.lt.s32.totalorder %s410_s26, %s410_s26 }
   0x8   :  { %p417_p3 = por %p416_p2, %p415_p1 }
   0xa   :  { %p418_p4 = pnand %p417_p3, %p411_p0 }
   0xc   :  { %421 = shalt.err (!%p418_p4)
}
   0xd   :  { %s511_s27 = smov 128   ;;  %s512_s28 = smov 8  }
   0xe   :  { %37 = dma.hbm_to_vmem [thread:$0]  %s610_s1, 2048, %s32_s25, [#allocation7], %s511_s27, %s511_s27, %s512_s28  }
   0xf   :  { %s513_s8 = smov [#allocation3]   ;;  %s514_s10 = smov [#allocation8]  }
  0x10   :  { %s22_s9 = sshll.u32 %s513_s8, 4  ;;  %s43_s11 = sshll.u32 %s514_s10, 4  ;;  %s23_s9 = int_to_ptr.vmem [resolvable:$true] %s22_s9  ;;  %s44_s11 = int_to_ptr.vmem [resolvable:$true] %s43_s11 }
  0x11   :  { %s430_s12 = scalar_lea.vmem %s23_s9, 128  ;;  %p435_p6 = scmp.lt.s32.totalorder %s23_s9, %s23_s9 }
  0x12   :  { %p431_p5 = scmp.ne.s32.totalorder %s23_s9, %s430_s12  ;;  %p436_p7 = scmp.lt.s32.totalorder %s430_s12, %s430_s12 }
  0x14   :  { %p437_p8 = por %p436_p7, %p435_p6 }
  0x16   :  { %p438_p9 = pnand %p437_p8, %p431_p5 }
  0x18   :  { %441 = shalt.err (!%p438_p9)
}
  0x19   :  { %25 = dma.hbm_to_vmem [thread:$0]  %s609_s0, 128, %s23_s9, [#allocation4]  }
  0x1a   :  { %s450_s15 = scalar_lea.vmem %s44_s11, 2048  ;;  %p455_p11 = scmp.lt.s32.totalorder %s44_s11, %s44_s11 }
  0x1b   :  { %p451_p10 = scmp.ne.s32.totalorder %s44_s11, %s450_s15  ;;  %p456_p12 = scmp.lt.s32.totalorder %s450_s15, %s450_s15 }
  0x1d   :  { %p457_p13 = por %p456_p12, %p455_p11 }
  0x1f   :  { %p458_p0 = pnand %p457_p13, %p451_p10 }
  0x21   :  { %461 = shalt.err (!%p458_p0)
}
  0x22   :  { %49 = dma.hbm_to_vmem [thread:$0]  %s611_s2, 2048, %s44_s11, [#allocation7], %s511_s27, %s511_s27, %s512_s28  }
  0x23   :  { %s515_s17 = smov [#allocation9]  }
  0x24   :  { %s55_s18 = sshll.u32 %s515_s17, 4  ;;  %s56_s18 = int_to_ptr.vmem [resolvable:$true] %s55_s18 }
  0x25   :  { %s470_s19 = scalar_lea.vmem %s56_s18, 2048  ;;  %p475_p2 = scmp.lt.s32.totalorder %s56_s18, %s56_s18 }
  0x26   :  { %p471_p1 = scmp.ne.s32.totalorder %s56_s18, %s470_s19  ;;  %p476_p3 = scmp.lt.s32.totalorder %s470_s19, %s470_s19 }
  0x28   :  { %p477_p4 = por %p476_p3, %p475_p2 }
  0x2a   :  { %p478_p5 = pnand %p477_p4, %p471_p1 }
  0x2c   :  { %481 = shalt.err (!%p478_p5)
}
  0x2d   :  { %61 = dma.hbm_to_vmem [thread:$0]  %s612_s3, 2048, %s56_s18, [#allocation10], %s511_s27, %s511_s27, %s512_s28  }
  0x2e   :  { %502 = dma.done.wait [#allocation4], 128  }
  0x2f   :  { %503 = vsyncadd [#allocation4], 4294967168 }
  0x30   :  { %504 = dma.done.wait [#allocation7], 4096  }
  0x31   :  { %505 = vsyncadd [#allocation7], 4294963200 }
  0x32   :  { %506 = dma.done.wait [#allocation10], 2048  }
  0x33   :  { %507 = vsyncadd [#allocation10], 4294965248  ;;  %v516_v0 = vmov 0.0   ;;  %vm517_vm0 = vmmov 0   ;;  %v116_v1 = vld [vmem:[#allocation8 + $0x78] sm:$0xff]  ;;  %v115_v3 = vld [vmem:[#allocation8 + $0x70] sm:$0xff] }
  0x34   :  { %324 = vmatprep.subr.mxu0 %v516_v0  ;;  %356 = vmatprep.mubr.msk.f32.mxu0 %vm517_vm0, %v516_v0  ;;  %v147_v2 = vmul.f32 1.442695, %v116_v1  ;;  %v145_v4 = vmul.f32 1.442695, %v115_v3  ;;  %v114_v5 = vld [vmem:[#allocation8 + $0x68] sm:$0xff]  ;;  %v113_v7 = vld [vmem:[#allocation8 + $0x60] sm:$0xff] }
  0x35   :  { %v143_v6 = vmul.f32 1.442695, %v114_v5  ;;  %v141_v8 = vmul.f32 1.442695, %v113_v7  ;;  %v112_v9 = vld [vmem:[#allocation8 + $0x58] sm:$0xff]  ;;  %v111_v11 = vld [vmem:[#allocation8 + $0x50] sm:$0xff] }
  0x36   :  { %368 = vpow2.f32 %v147_v2  ;;  %v139_v10 = vmul.f32 1.442695, %v112_v9  ;;  %v137_v12 = vmul.f32 1.442695, %v111_v11  ;;  %v164_v13 = vld [vmem:[#allocation9 + $0x78] sm:$0xff]  ;;  %v110_v14 = vld [vmem:[#allocation8 + $0x48] sm:$0xff] }
  0x37   :  { %370 = vpow2.f32 %v145_v4  ;;  %v163_v15 = vld [vmem:[#allocation9 + $0x70] sm:$0xff]  ;;  %v100_v17 = vld [vmem:[#allocation6 + $0x78] sm:$0xff]  ;;  %v135_v20 = vmul.f32 1.442695, %v110_v14  ;;  %v162_v24 = vld [vmem:[#allocation9 + $0x68] sm:$0xff]  ;;  %s518_s25 = smov [#allocation11]  }
  0x38   :  { %372 = vpow2.f32 %v143_v6  ;;  %v99_v22 = vld [vmem:[#allocation6 + $0x70] sm:$0xff]  ;;  %v109_v25 = vld [vmem:[#allocation8 + $0x40] sm:$0xff]  ;;  %v98_v31 = vld [vmem:[#allocation6 + $0x68] sm:$0xff]  ;;  %s296_s26 = sshll.u32 %s518_s25, 4  ;;  %s297_s26 = int_to_ptr.vmem [resolvable:$true] %s296_s26 }
  0x39   :  { %374 = vpow2.f32 %v141_v8  ;;  %v133_v29 = vmul.f32 1.442695, %v109_v25  ;;  %v161_v32 = vld [vmem:[#allocation9 + $0x60] sm:$0xff]  ;;  %v108_v33 = vld [vmem:[#allocation8 + $0x38] sm:$0xff]  ;;  %v107_v40 = vld [vmem:[#allocation8 + $0x30] sm:$0xff]  ;;  %p487_p7 = scmp.lt.s32.totalorder %s297_s26, %s297_s26 }
  0x3a   :  { %376 = vpow2.f32 %v139_v10  ;;  %v131_v36 = vmul.f32 1.442695, %v108_v33  ;;  %v97_v38 = vld [vmem:[#allocation6 + $0x60] sm:$0xff]  ;;  %v160_v39 = vld [vmem:[#allocation9 + $0x58] sm:$0xff]  ;;  %v129_v43 = vmul.f32 1.442695, %v107_v40 }
  0x3b   :  { %378 = vpow2.f32 %v137_v12  ;;  %v96_v45 = vld [vmem:[#allocation6 + $0x58] sm:$0xff]  ;;  %v159_v46 = vld [vmem:[#allocation9 + $0x50] sm:$0xff]  ;;  %v106_v47 = vld [vmem:[#allocation8 + $0x28] sm:$0xff] }
  0x3c   :  { %380 = vpow2.f32 %v135_v20  ;;  %v127_v50 = vmul.f32 1.442695, %v106_v47  ;;  %v95_v52 = vld [vmem:[#allocation6 + $0x50] sm:$0xff]  ;;  %v158_v53 = vld [vmem:[#allocation9 + $0x48] sm:$0xff]  ;;  %v105_v54 = vld [vmem:[#allocation8 + $0x20] sm:$0xff] }
  0x3d   :  { %382 = vpow2.f32 %v133_v29  ;;  %v125_v57 = vmul.f32 1.442695, %v105_v54  ;;  %v94_v59 = vld [vmem:[#allocation6 + $0x48] sm:$0xff]  ;;  %v157_v60 = vld [vmem:[#allocation9 + $0x40] sm:$0xff]  ;;  %v104_v61 = vld [vmem:[#allocation8 + $0x18] sm:$0xff] }
  0x3e   :  { %384 = vpow2.f32 %v131_v36  ;;  %v123_v1 = vmul.f32 1.442695, %v104_v61  ;;  %v93_v3 = vld [vmem:[#allocation6 + $0x40] sm:$0xff]  ;;  %v156_v4 = vld [vmem:[#allocation9 + $0x38] sm:$0xff]  ;;  %v103_v5 = vld [vmem:[#allocation8 + $0x10] sm:$0xff] }
  0x3f   :  { %386 = vpow2.f32 %v129_v43  ;;  %v121_v8 = vmul.f32 1.442695, %v103_v5  ;;  %v92_v10 = vld [vmem:[#allocation6 + $0x38] sm:$0xff]  ;;  %v155_v11 = vld [vmem:[#allocation9 + $0x30] sm:$0xff]  ;;  %v102_v12 = vld [vmem:[#allocation8 + $0x8] sm:$0xff] }
  0x40   :  { %388 = vpow2.f32 %v127_v50  ;;  %v153_v25 = vld [vmem:[#allocation9 + $0x20] sm:$0xff]  ;;  %v150_v40 = vld [vmem:[#allocation9 + $0x8] sm:$0xff]  ;;  %v198_v50 = vld [vmem:[#allocation3] sm:$0xff] }
  0x41   :  { %390 = vpow2.f32 %v125_v57  ;;  %v89_v29 = vld [vmem:[#allocation6 + $0x20] sm:$0xff] }
  0x42   :  { %392 = vpow2.f32 %v123_v1 }
  0x43   :  { %v369_v16 = vpop.eup %368  ;;  %394 = vpow2.f32 %v121_v8 }
  0x44   :  { %v371_v18 = vpop.eup %370  ;;  %v180_v19 = vmul.f32 %v369_v16, %v164_v13 }
  0x45   :  { %v373_v21 = vpop.eup %372  ;;  %v179_v23 = vmul.f32 %v371_v18, %v163_v15  ;;  %v119_v15 = vmul.f32 1.442695, %v102_v12  ;;  %v154_v18 = vld [vmem:[#allocation9 + $0x28] sm:$0xff] }
  0x46   :  { %v196_v26 = vadd.f32 %v180_v19, %v100_v17  ;;  %v178_v28 = vmul.f32 %v373_v21, %v162_v24  ;;  %v375_v30 = vpop.eup %374  ;;  %v91_v17 = vld [vmem:[#allocation6 + $0x30] sm:$0xff]  ;;  %v101_v19 = vld [vmem:[#allocation8] sm:$0xff]  ;;  %v90_v24 = vld [vmem:[#allocation6 + $0x28] sm:$0xff] }
  0x47   :  { %v195_v27 = vadd.f32 %v179_v23, %v99_v22  ;;  %v177_v35 = vmul.f32 %v375_v30, %v161_v32  ;;  %v377_v37 = vpop.eup %376  ;;  %396 = vpow2.f32 %v119_v15  ;;  %v117_v22 = vmul.f32 1.442695, %v101_v19  ;;  %v152_v30 = vld [vmem:[#allocation9 + $0x18] sm:$0xff] }
  0x48   :  { %325 = vmatpush3.xpose.msra.mxu0 %v196_v26  ;;  %v194_v34 = vadd.f32 %v178_v28, %v98_v31  ;;  %v176_v42 = vmul.f32 %v377_v37, %v160_v39  ;;  %v379_v44 = vpop.eup %378  ;;  %v87_v39 = vld [vmem:[#allocation6 + $0x10] sm:$0xff] }
  0x49   :  { %326 = vmatprep.subr.mxu0 %v516_v0  ;;  %v193_v41 = vadd.f32 %v177_v35, %v97_v38  ;;  %v175_v49 = vmul.f32 %v379_v44, %v159_v46  ;;  %v381_v51 = vpop.eup %380  ;;  %398 = vpow2.f32 %v117_v22  ;;  %v151_v35 = vld [vmem:[#allocation9 + $0x10] sm:$0xff]  ;;  %v86_v44 = vld [vmem:[#allocation6 + $0x8] sm:$0xff] }
  0x4a   :  { %v192_v48 = vadd.f32 %v176_v42, %v96_v45  ;;  %v174_v56 = vmul.f32 %v381_v51, %v158_v53  ;;  %v383_v58 = vpop.eup %382  ;;  %v149_v45 = vld [vmem:[#allocation9] sm:$0xff]  ;;  %v275_v51 = vld [vmem:[%s614_s5] sm:$0x1]  ;;  %v283_v53 = vlaneseq  ;;  %s482_s5 = scalar_lea.vmem %s297_s26, 128 }
  0x4b   :  { %v191_v55 = vadd.f32 %v175_v49, %v95_v52  ;;  %v173_v63 = vmul.f32 %v383_v58, %v157_v60  ;;  %v385_v2 = vpop.eup %384  ;;  %v276_v52 = vmul.f32 1.442695, %v275_v51  ;;  %p483_p6 = scmp.ne.s32.totalorder %s297_s26, %s482_s5  ;;  %p488_p8 = scmp.lt.s32.totalorder %s482_s5, %s482_s5 }
  0x4c   :  { %327 = vmatpush3.xpose.msra.mxu0 %v195_v27  ;;  %v190_v62 = vadd.f32 %v174_v56, %v94_v59  ;;  %v172_v7 = vmul.f32 %v385_v2, %v156_v4  ;;  %v387_v9 = vpop.eup %386  ;;  %v284_v57 = vshrl.u32 %v283_v53, 7 }
  0x4d   :  { %328 = vmatprep.subr.mxu0 %v516_v0  ;;  %v189_v6 = vadd.f32 %v173_v63, %v93_v3  ;;  %v171_v14 = vmul.f32 %v387_v9, %v155_v11  ;;  %v389_v16 = vpop.eup %388  ;;  %400 = vpow2.f32 %v276_v52  ;;  %p489_p9 = por %p488_p8, %p487_p7 }
  0x4e   :  { %v188_v13 = vadd.f32 %v172_v7, %v92_v10  ;;  %v170_v21 = vmul.f32 %v389_v16, %v154_v18  ;;  %v391_v23 = vpop.eup %390  ;;  %v285_v59 = vsub.s32 0, %v284_v57 }
  0x4f   :  { %v187_v20 = vadd.f32 %v171_v14, %v91_v17  ;;  %v169_v27 = vmul.f32 %v391_v23, %v153_v25  ;;  %v393_v28 = vpop.eup %392  ;;  %p490_p10 = pnand %p489_p9, %p483_p6 }
  0x50   :  { %329 = vmatpush3.xpose.msra.mxu0 %v194_v34  ;;  %v186_v26 = vadd.f32 %v170_v21, %v90_v24  ;;  %v168_v32 = vmul.f32 %v393_v28, %v152_v30  ;;  %v395_v33 = vpop.eup %394  ;;  %v88_v34 = vld [vmem:[#allocation6 + $0x18] sm:$0xff] }
  0x51   :  { %330 = vmatprep.subr.mxu0 %v516_v0  ;;  %v185_v31 = vadd.f32 %v169_v27, %v89_v29  ;;  %v167_v37 = vmul.f32 %v395_v33, %v151_v35 }
  0x52   :  { %v184_v36 = vadd.f32 %v168_v32, %v88_v34 }
  0x54   :  { %331 = vmatpush3.xpose.msra.mxu0 %v193_v41  ;;  %v397_v38 = vpop.eup %396  ;;  %v183_v41 = vadd.f32 %v167_v37, %v87_v39 }
  0x55   :  { %332 = vmatprep.subr.mxu0 %v516_v0  ;;  %v166_v42 = vmul.f32 %v397_v38, %v150_v40 }
  0x56   :  { %v399_v43 = vpop.eup %398 }
  0x57   :  { %v182_v46 = vadd.f32 %v166_v42, %v86_v44  ;;  %v165_v47 = vmul.f32 %v399_v43, %v149_v45 }
  0x58   :  { %333 = vmatpush3.xpose.msra.mxu0 %v192_v48  ;;  %v85_v48 = vld [vmem:[#allocation6] sm:$0xff] }
  0x59   :  { %334 = vmatprep.subr.mxu0 %v516_v0  ;;  %v181_v49 = vadd.f32 %v165_v47, %v85_v48 }
  0x5a   :  { %v401_v54 = vpop.eup %400 }
  0x5c   :  { %335 = vmatpush3.xpose.msra.mxu0 %v191_v55  ;;  %v278_v55 = vld [vmem:[%s615_s6] sm:$0x1] }
  0x5d   :  { %336 = vmatprep.subr.mxu0 %v516_v0  ;;  %v279_v56 = vmul.f32 %v401_v54, %v278_v55 }
  0x60   :  { %337 = vmatpush3.xpose.msra.mxu0 %v190_v62 }
  0x61   :  { %338 = vmatprep.subr.mxu0 %v516_v0 }
  0x64   :  { %339 = vmatpush3.xpose.msra.mxu0 %v189_v6 }
  0x65   :  { %340 = vmatprep.subr.mxu0 %v516_v0 }
  0x68   :  { %341 = vmatpush3.xpose.msra.mxu0 %v188_v13 }
  0x69   :  { %342 = vmatprep.subr.mxu0 %v516_v0 }
  0x6c   :  { %343 = vmatpush3.xpose.msra.mxu0 %v187_v20 }
  0x6d   :  { %344 = vmatprep.subr.mxu0 %v516_v0 }
  0x70   :  { %345 = vmatpush3.xpose.msra.mxu0 %v186_v26 }
  0x71   :  { %346 = vmatprep.subr.mxu0 %v516_v0 }
  0x74   :  { %347 = vmatpush3.xpose.msra.mxu0 %v185_v31 }
  0x75   :  { %348 = vmatprep.subr.mxu0 %v516_v0 }
  0x78   :  { %349 = vmatpush3.xpose.msra.mxu0 %v184_v36 }
  0x79   :  { %350 = vmatprep.subr.mxu0 %v516_v0 }
  0x7c   :  { %351 = vmatpush3.xpose.msra.mxu0 %v183_v41 }
  0x7d   :  { %352 = vmatprep.subr.mxu0 %v516_v0 }
  0x80   :  { %353 = vmatpush3.xpose.msra.mxu0 %v182_v46 }
  0x81   :  { %354 = vmatprep.subr.mxu0 %v516_v0  ;;  %v274_v0 = vld [vmem:[%s613_s4] sm:$0x1] }
  0x82   :  { %v280_v58 = vadd.f32 %v279_v56, %v274_v0 }
  0x84   :  { %355 = vmatpush3.xpose.msra.mxu0 %v181_v49  ;;  %v286_v60 = vrot.slane %v280_v58, %v285_v59 }
  0x87   :  { %357 = vmatmul.mubr.f32.vlgmr.msra.gmra.mxu0 %v198_v50 }
 0x147   :  { %v265_v61 = vpop.f32.mrf.mxu0 }
 0x148   :  { %v288_v62 = vadd.f32 %v286_v60, %v265_v61 }
 0x149   :  { %v358_v63 = vpop.f32.mrf.mxu0 }
 0x14a   :  { %289 = vst [vmem:[#allocation11] sm:$0xff] %v288_v62 }
 0x14b   :  { %493 = shalt.err (!%p490_p10)
}
 0x14c   :  { %299 = dma.vmem_to_hbm [thread:$0]  %s297_s26, 128, %s616_s7, [#allocation5]  }
 0x14d   :  { %508 = dma.done.wait [#allocation5], 128  }
 0x14e   :  { %509 = vsyncadd [#allocation5], 4294967168 }
 0x14f   :  { %303 = vsyncpa [#allocation4], 1 }
 0x150   :  { %304 = vsyncpa [#allocation7], 1 }
 0x151   :  { %305 = vsyncpa [#allocation10], 1 }
 0x152   :  { %306 = vsyncpa [#allocation5], 1 }

</bundles_post_ra>
